<compile_context>
chip_gen: v7x
topology: tpu7x:2x2x1
jax: 0.10.0
libtpu: 0.0.40
codegen_flags: <defaults>
</compile_context>

<pallas_src>
import functools
import math

import jax
import jax.numpy as jnp
from jax.experimental import pallas as pl
from jax.experimental.pallas import tpu as pltpu

_EPS = 1e-5
# Set to jnp.bfloat16 on v6e/v7x when the matmuls become MXU-bound (numerics
# then differ slightly from the f32 PyTorch reference). f32 keeps exact parity.
_MM_DTYPE = jnp.float32


# ------------------------------ fused kernel --------------------------------

def _policy_head_kernel(x_ref, wc_ref, g_ref, b_ref, wfc_ref, bfc_ref, o_ref,
                        *, n, hw, c_mid):
    # x_ref   : (N, Cin, HW)   input, NCHW order with H*W merged (free reshape)
    # wc_ref  : (6, Cin)       1x1 conv weight
    # g_ref   : (6, 1)         BN gamma        b_ref: (6, 1) BN beta
    # wfc_ref : (6, HW, out)   FC weight with NCHW flatten folded in
    # bfc_ref : (1, out)       FC bias
    # o_ref   : (N, out)
    wc = wc_ref[...].astype(_MM_DTYPE)

    # --- 1x1 conv: channel-on-sublane, spatial-on-lane (lane-dense) ---------
    ys = []
    for i in range(n):                       # static unroll; N is small for a head
        xi = x_ref[i].astype(_MM_DTYPE)      # (Cin, HW)
        ys.append(jnp.dot(wc, xi, preferred_element_type=jnp.float32))  # (6, HW)

    # --- BatchNorm2d, training mode: batch stats over (N, H, W) per channel -
    inv_cnt = 1.0 / float(n * hw)
    s = jnp.zeros((c_mid, 1), jnp.float32)
    for y in ys:
        s = s + jnp.sum(y, axis=1, keepdims=True)       # lane-axis reduction
    mean = s * inv_cnt
    v = jnp.zeros((c_mid, 1), jnp.float32)
    for y in ys:
        v = v + jnp.sum(jnp.square(y - mean), axis=1, keepdims=True)
    var = v * inv_cnt                                    # biased variance (torch BN fwd)

    scale = g_ref[...] * jax.lax.rsqrt(var + _EPS)       # (6, 1), rsqrt on EUP
    shift = b_ref[...] - mean * scale                    # (6, 1)

    # --- fused affine + ReLU + FC (NCHW flatten folded into wfc layout) -----
    bias = bfc_ref[...]                                  # (1, out)
    for i in range(n):
        a = jnp.maximum(ys[i] * scale + shift, 0.0)      # (6, HW), stays in VMEM/vregs
        row = bias
        for c in range(c_mid):
            # out[i, :] += a[c, :] @ W_fc[:, c*HW:(c+1)*HW].T  (pre-permuted host-side)
            row = row + jnp.dot(a[c:c + 1, :].astype(_MM_DTYPE),
                                wfc_ref[c].astype(_MM_DTYPE),
                                preferred_element_type=jnp.float32)
        o_ref[pl.ds(i, 1), :] = row


# -------------------------------- wrapper -----------------------------------

def policy_head_forward(x_nchw, params):
    n, c, h, w = x_nchw.shape
    hw = h * w
    c_mid = params["conv_w"].shape[0]                    # = 6
    out_size = params["fc_b"].shape[-1]
    x3 = x_nchw.reshape(n, c, hw)                        # free reshape, keeps NCHW order
    kernel = functools.partial(_policy_head_kernel, n=n, hw=hw, c_mid=c_mid)
    return pl.pallas_call(
        kernel,
        out_shape=jax.ShapeDtypeStruct((n, out_size), jnp.float32),
        in_specs=[pl.BlockSpec(memory_space=pltpu.MemorySpace.VMEM)
                  for _ in range(6)],
        out_specs=pl.BlockSpec(memory_space=pltpu.MemorySpace.VMEM),
    )(x3, params["conv_w"], params["gamma"], params["beta"],
      params["fc_w3"], params["fc_b"])


# ----------------------- parameter init (torch-faithful) --------------------

def init_policy_head(key, residual_channels, input_size, out_size):
    k_conv, k_w, k_b = jax.random.split(key, 3)
    # conv1x1 weight (6, Cin, 1, 1); kaiming_normal_(mode='fan_out', relu):
    # std = sqrt(2 / (out_channels * k * k)) = sqrt(2 / 6)
    std = math.sqrt(2.0 / 6.0)
    conv_w = jax.random.normal(k_conv, (6, residual_channels), jnp.float32) * std
    gamma = jnp.ones((6, 1), jnp.float32)
    beta = jnp.zeros((6, 1), jnp.float32)
    # nn.Linear default init: U(-1/sqrt(fan_in), 1/sqrt(fan_in)) for W and b.
    fan_in = 6 * input_size
    bound = 1.0 / math.sqrt(fan_in)
    fc_w = jax.random.uniform(k_w, (out_size, fan_in), jnp.float32, -bound, bound)
    fc_b = jax.random.uniform(k_b, (1, out_size), jnp.float32, -bound, bound)
    # Fold the NCHW flatten (col index = c*HW + s) into the weight layout:
    # fc_w3[c, s, o] = fc_w[o, c*HW + s]  ->  shape (6, HW, out)
    fc_w3 = jnp.transpose(fc_w.reshape(out_size, 6, input_size), (1, 2, 0))
    return {"conv_w": conv_w, "gamma": gamma, "beta": beta,
            "fc_w3": fc_w3, "fc_b": fc_b}


# ------------------------- pure-JAX reference (check) -----------------------

def policy_head_reference(x_nchw, params):
    n, c, h, w = x_nchw.shape
    hw = h * w
    xt = x_nchw.reshape(n, c, hw)                                    # (N, Cin, HW)
    y = jnp.einsum("oc,ncs->nos", params["conv_w"], xt)              # (N, 6, HW)
    mean = jnp.mean(y, axis=(0, 2), keepdims=True)
    var = jnp.mean(jnp.square(y - mean), axis=(0, 2), keepdims=True)
    g = params["gamma"].reshape(1, -1, 1)
    b = params["beta"].reshape(1, -1, 1)
    y = (y - mean) * jax.lax.rsqrt(var + _EPS) * g + b
    y = jnp.maximum(y, 0.0)
    flat = y.reshape(n, -1)                                          # NCHW flatten
    w2 = params["fc_w3"].reshape(6 * hw, -1)                         # rows = c*HW + s
    return flat @ w2 + params["fc_b"]


# ----------------------------------- main ------------------------------------

if __name__ == "__main__":
    key = jax.random.PRNGKey(0)
    k_x, k_p = jax.random.split(key)

    N, C, H, W = 2, 16, 8, 8          # residual_channels=16, input_size=H*W=64
    out_size = 32

    x = jax.random.normal(k_x, (N, C, H, W), jnp.float32)
    params = init_policy_head(k_p, C, H * W, out_size)

    out = policy_head_forward(x, params)
    out = jax.block_until_ready(out)

    ref = policy_head_reference(x, params)
    assert out.shape == (N, out_size)
    assert bool(jnp.allclose(out, ref, atol=1e-3, rtol=1e-3)), "mismatch vs reference"
    print("KERNEL_OK")
</pallas_src>

<mosaic_0001>
module attributes {stable_mosaic.version = 11 : i64} {
  func.func @_policy_head_kernel(%arg0: memref<2x16x64xf32, #tpu.memory_space<vmem>>, %arg1: memref<6x16xf32, #tpu.memory_space<vmem>>, %arg2: memref<6x1xf32, #tpu.memory_space<vmem>>, %arg3: memref<6x1xf32, #tpu.memory_space<vmem>>, %arg4: memref<6x64x32xf32, #tpu.memory_space<vmem>>, %arg5: memref<1x32xf32, #tpu.memory_space<vmem>>, %arg6: memref<2x32xf32, #tpu.memory_space<vmem>>) attributes {dimension_semantics = [], scalar_prefetch = 0 : i64, scratch_operands = 0 : i64, tpu.core_type = #tpu.core_type<tc>} {
    %c0 = arith.constant 0 : index
    %c0_0 = arith.constant 0 : index
    %0 = vector.load %arg1[%c0, %c0_0] : memref<6x16xf32, #tpu.memory_space<vmem>>, vector<6x16xf32>
    %c0_1 = arith.constant 0 : index
    %c0_2 = arith.constant 0 : index
    %c0_3 = arith.constant 0 : index
    %1 = vector.load %arg0[%c0_1, %c0_2, %c0_3] : memref<2x16x64xf32, #tpu.memory_space<vmem>>, vector<1x16x64xf32>
    %2 = vector.shape_cast %1 : vector<1x16x64xf32> to vector<16x64xf32>
    %cst = arith.constant dense<0.000000e+00> : vector<6x64xf32>
    %3 = tpu.matmul %0, %2, %cst {dimension_numbers = #tpu.dot_dimension_numbers<[1], [0], [0], [1], [0, 0, 1, 1], [], []>} : vector<6x16xf32>, vector<16x64xf32>, vector<6x64xf32> -> vector<6x64xf32>
    %c1 = arith.constant 1 : index
    %c0_4 = arith.constant 0 : index
    %c0_5 = arith.constant 0 : index
    %4 = vector.load %arg0[%c1, %c0_4, %c0_5] : memref<2x16x64xf32, #tpu.memory_space<vmem>>, vector<1x16x64xf32>
    %5 = vector.shape_cast %4 : vector<1x16x64xf32> to vector<16x64xf32>
    %cst_6 = arith.constant dense<0.000000e+00> : vector<6x64xf32>
    %6 = tpu.matmul %0, %5, %cst_6 {dimension_numbers = #tpu.dot_dimension_numbers<[1], [0], [0], [1], [0, 0, 1, 1], [], []>} : vector<6x16xf32>, vector<16x64xf32>, vector<6x64xf32> -> vector<6x64xf32>
    %cst_7 = arith.constant 0.000000e+00 : f32
    %7 = vector.broadcast %cst_7 : f32 to vector<6x1xf32>
    %cst_8 = arith.constant dense<0.000000e+00> : vector<6xf32>
    %8 = vector.multi_reduction <add>, %3, %cst_8 [1] : vector<6x64xf32> to vector<6xf32>
    %9 = vector.shape_cast %8 : vector<6xf32> to vector<6x1xf32>
    %10 = arith.addf %7, %9 : vector<6x1xf32>
    %cst_9 = arith.constant dense<0.000000e+00> : vector<6xf32>
    %11 = vector.multi_reduction <add>, %6, %cst_9 [1] : vector<6x64xf32> to vector<6xf32>
    %12 = vector.shape_cast %11 : vector<6xf32> to vector<6x1xf32>
    %13 = arith.addf %10, %12 : vector<6x1xf32>
    %cst_10 = arith.constant 7.812500e-03 : f32
    %14 = vector.broadcast %cst_10 : f32 to vector<6x1xf32>
    %15 = arith.mulf %13, %14 : vector<6x1xf32>
    %cst_11 = arith.constant 0.000000e+00 : f32
    %16 = vector.broadcast %cst_11 : f32 to vector<6x1xf32>
    %17 = vector.broadcast %15 : vector<6x1xf32> to vector<6x64xf32>
    %18 = arith.subf %3, %17 : vector<6x64xf32>
    %19 = arith.mulf %18, %18 : vector<6x64xf32>
    %cst_12 = arith.constant dense<0.000000e+00> : vector<6xf32>
    %20 = vector.multi_reduction <add>, %19, %cst_12 [1] : vector<6x64xf32> to vector<6xf32>
    %21 = vector.shape_cast %20 : vector<6xf32> to vector<6x1xf32>
    %22 = arith.addf %16, %21 : vector<6x1xf32>
    %23 = vector.broadcast %15 : vector<6x1xf32> to vector<6x64xf32>
    %24 = arith.subf %6, %23 : vector<6x64xf32>
    %25 = arith.mulf %24, %24 : vector<6x64xf32>
    %cst_13 = arith.constant dense<0.000000e+00> : vector<6xf32>
    %26 = vector.multi_reduction <add>, %25, %cst_13 [1] : vector<6x64xf32> to vector<6xf32>
    %27 = vector.shape_cast %26 : vector<6xf32> to vector<6x1xf32>
    %28 = arith.addf %22, %27 : vector<6x1xf32>
    %cst_14 = arith.constant 7.812500e-03 : f32
    %29 = vector.broadcast %cst_14 : f32 to vector<6x1xf32>
    %30 = arith.mulf %28, %29 : vector<6x1xf32>
    %c0_15 = arith.constant 0 : index
    %c0_16 = arith.constant 0 : index
    %31 = vector.load %arg2[%c0_15, %c0_16] : memref<6x1xf32, #tpu.memory_space<vmem>>, vector<6x1xf32>
    %cst_17 = arith.constant 9.99999974E-6 : f32
    %32 = vector.broadcast %cst_17 : f32 to vector<6x1xf32>
    %33 = arith.addf %30, %32 : vector<6x1xf32>
    %34 = math.rsqrt %33 : vector<6x1xf32>
    %35 = arith.mulf %31, %34 : vector<6x1xf32>
    %c0_18 = arith.constant 0 : index
    %c0_19 = arith.constant 0 : index
    %36 = vector.load %arg3[%c0_18, %c0_19] : memref<6x1xf32, #tpu.memory_space<vmem>>, vector<6x1xf32>
    %37 = arith.mulf %15, %35 : vector<6x1xf32>
    %38 = arith.subf %36, %37 : vector<6x1xf32>
    %c0_20 = arith.constant 0 : index
    %c0_21 = arith.constant 0 : index
    %39 = vector.load %arg5[%c0_20, %c0_21] : memref<1x32xf32, #tpu.memory_space<vmem>>, vector<1x32xf32>
    %40 = vector.broadcast %35 : vector<6x1xf32> to vector<6x64xf32>
    %41 = arith.mulf %3, %40 : vector<6x64xf32>
    %42 = vector.broadcast %38 : vector<6x1xf32> to vector<6x64xf32>
    %43 = arith.addf %41, %42 : vector<6x64xf32>
    %cst_22 = arith.constant 0.000000e+00 : f32
    %44 = vector.broadcast %cst_22 : f32 to vector<6x64xf32>
    %45 = arith.maximumf %43, %44 : vector<6x64xf32>
    %46 = vector.extract_strided_slice %45 {offsets = [0, 0], sizes = [1, 64], strides = [1, 1]} : vector<6x64xf32> to vector<1x64xf32>
    %c0_23 = arith.constant 0 : index
    %c0_24 = arith.constant 0 : index
    %c0_25 = arith.constant 0 : index
    %47 = vector.load %arg4[%c0_23, %c0_24, %c0_25] : memref<6x64x32xf32, #tpu.memory_space<vmem>>, vector<1x64x32xf32>
    %48 = vector.shape_cast %47 : vector<1x64x32xf32> to vector<64x32xf32>
    %cst_26 = arith.constant dense<0.000000e+00> : vector<1x32xf32>
    %49 = tpu.matmul %46, %48, %cst_26 {dimension_numbers = #tpu.dot_dimension_numbers<[1], [0], [0], [1], [0, 0, 1, 1], [], []>} : vector<1x64xf32>, vector<64x32xf32>, vector<1x32xf32> -> vector<1x32xf32>
    %50 = arith.addf %39, %49 : vector<1x32xf32>
    %51 = vector.extract_strided_slice %45 {offsets = [1, 0], sizes = [1, 64], strides = [1, 1]} : vector<6x64xf32> to vector<1x64xf32>
    %c1_27 = arith.constant 1 : index
    %c0_28 = arith.constant 0 : index
    %c0_29 = arith.constant 0 : index
    %52 = vector.load %arg4[%c1_27, %c0_28, %c0_29] : memref<6x64x32xf32, #tpu.memory_space<vmem>>, vector<1x64x32xf32>
    %53 = vector.shape_cast %52 : vector<1x64x32xf32> to vector<64x32xf32>
    %cst_30 = arith.constant dense<0.000000e+00> : vector<1x32xf32>
    %54 = tpu.matmul %51, %53, %cst_30 {dimension_numbers = #tpu.dot_dimension_numbers<[1], [0], [0], [1], [0, 0, 1, 1], [], []>} : vector<1x64xf32>, vector<64x32xf32>, vector<1x32xf32> -> vector<1x32xf32>
    %55 = arith.addf %50, %54 : vector<1x32xf32>
    %56 = vector.extract_strided_slice %45 {offsets = [2, 0], sizes = [1, 64], strides = [1, 1]} : vector<6x64xf32> to vector<1x64xf32>
    %c2 = arith.constant 2 : index
    %c0_31 = arith.constant 0 : index
    %c0_32 = arith.constant 0 : index
    %57 = vector.load %arg4[%c2, %c0_31, %c0_32] : memref<6x64x32xf32, #tpu.memory_space<vmem>>, vector<1x64x32xf32>
    %58 = vector.shape_cast %57 : vector<1x64x32xf32> to vector<64x32xf32>
    %cst_33 = arith.constant dense<0.000000e+00> : vector<1x32xf32>
    %59 = tpu.matmul %56, %58, %cst_33 {dimension_numbers = #tpu.dot_dimension_numbers<[1], [0], [0], [1], [0, 0, 1, 1], [], []>} : vector<1x64xf32>, vector<64x32xf32>, vector<1x32xf32> -> vector<1x32xf32>
    %60 = arith.addf %55, %59 : vector<1x32xf32>
    %61 = vector.extract_strided_slice %45 {offsets = [3, 0], sizes = [1, 64], strides = [1, 1]} : vector<6x64xf32> to vector<1x64xf32>
    %c3 = arith.constant 3 : index
    %c0_34 = arith.constant 0 : index
    %c0_35 = arith.constant 0 : index
    %62 = vector.load %arg4[%c3, %c0_34, %c0_35] : memref<6x64x32xf32, #tpu.memory_space<vmem>>, vector<1x64x32xf32>
    %63 = vector.shape_cast %62 : vector<1x64x32xf32> to vector<64x32xf32>
    %cst_36 = arith.constant dense<0.000000e+00> : vector<1x32xf32>
    %64 = tpu.matmul %61, %63, %cst_36 {dimension_numbers = #tpu.dot_dimension_numbers<[1], [0], [0], [1], [0, 0, 1, 1], [], []>} : vector<1x64xf32>, vector<64x32xf32>, vector<1x32xf32> -> vector<1x32xf32>
    %65 = arith.addf %60, %64 : vector<1x32xf32>
    %66 = vector.extract_strided_slice %45 {offsets = [4, 0], sizes = [1, 64], strides = [1, 1]} : vector<6x64xf32> to vector<1x64xf32>
    %c4 = arith.constant 4 : index
    %c0_37 = arith.constant 0 : index
    %c0_38 = arith.constant 0 : index
    %67 = vector.load %arg4[%c4, %c0_37, %c0_38] : memref<6x64x32xf32, #tpu.memory_space<vmem>>, vector<1x64x32xf32>
    %68 = vector.shape_cast %67 : vector<1x64x32xf32> to vector<64x32xf32>
    %cst_39 = arith.constant dense<0.000000e+00> : vector<1x32xf32>
    %69 = tpu.matmul %66, %68, %cst_39 {dimension_numbers = #tpu.dot_dimension_numbers<[1], [0], [0], [1], [0, 0, 1, 1], [], []>} : vector<1x64xf32>, vector<64x32xf32>, vector<1x32xf32> -> vector<1x32xf32>
    %70 = arith.addf %65, %69 : vector<1x32xf32>
    %71 = vector.extract_strided_slice %45 {offsets = [5, 0], sizes = [1, 64], strides = [1, 1]} : vector<6x64xf32> to vector<1x64xf32>
    %c5 = arith.constant 5 : index
    %c0_40 = arith.constant 0 : index
    %c0_41 = arith.constant 0 : index
    %72 = vector.load %arg4[%c5, %c0_40, %c0_41] : memref<6x64x32xf32, #tpu.memory_space<vmem>>, vector<1x64x32xf32>
    %73 = vector.shape_cast %72 : vector<1x64x32xf32> to vector<64x32xf32>
    %cst_42 = arith.constant dense<0.000000e+00> : vector<1x32xf32>
    %74 = tpu.matmul %71, %73, %cst_42 {dimension_numbers = #tpu.dot_dimension_numbers<[1], [0], [0], [1], [0, 0, 1, 1], [], []>} : vector<1x64xf32>, vector<64x32xf32>, vector<1x32xf32> -> vector<1x32xf32>
    %75 = arith.addf %70, %74 : vector<1x32xf32>
    %c0_43 = arith.constant 0 : index
    %c0_44 = arith.constant 0 : index
    %76 = vector.load %arg6[%c0_43, %c0_44] : memref<2x32xf32, #tpu.memory_space<vmem>>, vector<1x32xf32>
    tpu.vector_store %arg6[%c0_43, %c0_44], %75 {strides = array<i32>} : memref<2x32xf32, #tpu.memory_space<vmem>>, vector<1x32xf32>,
    %77 = vector.broadcast %35 : vector<6x1xf32> to vector<6x64xf32>
    %78 = arith.mulf %6, %77 : vector<6x64xf32>
    %79 = vector.broadcast %38 : vector<6x1xf32> to vector<6x64xf32>
    %80 = arith.addf %78, %79 : vector<6x64xf32>
    %cst_45 = arith.constant 0.000000e+00 : f32
    %81 = vector.broadcast %cst_45 : f32 to vector<6x64xf32>
    %82 = arith.maximumf %80, %81 : vector<6x64xf32>
    %83 = vector.extract_strided_slice %82 {offsets = [0, 0], sizes = [1, 64], strides = [1, 1]} : vector<6x64xf32> to vector<1x64xf32>
    %c0_46 = arith.constant 0 : index
    %c0_47 = arith.constant 0 : index
    %c0_48 = arith.constant 0 : index
    %84 = vector.load %arg4[%c0_46, %c0_47, %c0_48] : memref<6x64x32xf32, #tpu.memory_space<vmem>>, vector<1x64x32xf32>
    %85 = vector.shape_cast %84 : vector<1x64x32xf32> to vector<64x32xf32>
    %cst_49 = arith.constant dense<0.000000e+00> : vector<1x32xf32>
    %86 = tpu.matmul %83, %85, %cst_49 {dimension_numbers = #tpu.dot_dimension_numbers<[1], [0], [0], [1], [0, 0, 1, 1], [], []>} : vector<1x64xf32>, vector<64x32xf32>, vector<1x32xf32> -> vector<1x32xf32>
    %87 = arith.addf %39, %86 : vector<1x32xf32>
    %88 = vector.extract_strided_slice %82 {offsets = [1, 0], sizes = [1, 64], strides = [1, 1]} : vector<6x64xf32> to vector<1x64xf32>
    %c1_50 = arith.constant 1 : index
    %c0_51 = arith.constant 0 : index
    %c0_52 = arith.constant 0 : index
    %89 = vector.load %arg4[%c1_50, %c0_51, %c0_52] : memref<6x64x32xf32, #tpu.memory_space<vmem>>, vector<1x64x32xf32>
    %90 = vector.shape_cast %89 : vector<1x64x32xf32> to vector<64x32xf32>
    %cst_53 = arith.constant dense<0.000000e+00> : vector<1x32xf32>
    %91 = tpu.matmul %88, %90, %cst_53 {dimension_numbers = #tpu.dot_dimension_numbers<[1], [0], [0], [1], [0, 0, 1, 1], [], []>} : vector<1x64xf32>, vector<64x32xf32>, vector<1x32xf32> -> vector<1x32xf32>
    %92 = arith.addf %87, %91 : vector<1x32xf32>
    %93 = vector.extract_strided_slice %82 {offsets = [2, 0], sizes = [1, 64], strides = [1, 1]} : vector<6x64xf32> to vector<1x64xf32>
    %c2_54 = arith.constant 2 : index
    %c0_55 = arith.constant 0 : index
    %c0_56 = arith.constant 0 : index
    %94 = vector.load %arg4[%c2_54, %c0_55, %c0_56] : memref<6x64x32xf32, #tpu.memory_space<vmem>>, vector<1x64x32xf32>
    %95 = vector.shape_cast %94 : vector<1x64x32xf32> to vector<64x32xf32>
    %cst_57 = arith.constant dense<0.000000e+00> : vector<1x32xf32>
    %96 = tpu.matmul %93, %95, %cst_57 {dimension_numbers = #tpu.dot_dimension_numbers<[1], [0], [0], [1], [0, 0, 1, 1], [], []>} : vector<1x64xf32>, vector<64x32xf32>, vector<1x32xf32> -> vector<1x32xf32>
    %97 = arith.addf %92, %96 : vector<1x32xf32>
    %98 = vector.extract_strided_slice %82 {offsets = [3, 0], sizes = [1, 64], strides = [1, 1]} : vector<6x64xf32> to vector<1x64xf32>
    %c3_58 = arith.constant 3 : index
    %c0_59 = arith.constant 0 : index
    %c0_60 = arith.constant 0 : index
    %99 = vector.load %arg4[%c3_58, %c0_59, %c0_60] : memref<6x64x32xf32, #tpu.memory_space<vmem>>, vector<1x64x32xf32>
    %100 = vector.shape_cast %99 : vector<1x64x32xf32> to vector<64x32xf32>
    %cst_61 = arith.constant dense<0.000000e+00> : vector<1x32xf32>
    %101 = tpu.matmul %98, %100, %cst_61 {dimension_numbers = #tpu.dot_dimension_numbers<[1], [0], [0], [1], [0, 0, 1, 1], [], []>} : vector<1x64xf32>, vector<64x32xf32>, vector<1x32xf32> -> vector<1x32xf32>
    %102 = arith.addf %97, %101 : vector<1x32xf32>
    %103 = vector.extract_strided_slice %82 {offsets = [4, 0], sizes = [1, 64], strides = [1, 1]} : vector<6x64xf32> to vector<1x64xf32>
    %c4_62 = arith.constant 4 : index
    %c0_63 = arith.constant 0 : index
    %c0_64 = arith.constant 0 : index
    %104 = vector.load %arg4[%c4_62, %c0_63, %c0_64] : memref<6x64x32xf32, #tpu.memory_space<vmem>>, vector<1x64x32xf32>
    %105 = vector.shape_cast %104 : vector<1x64x32xf32> to vector<64x32xf32>
    %cst_65 = arith.constant dense<0.000000e+00> : vector<1x32xf32>
    %106 = tpu.matmul %103, %105, %cst_65 {dimension_numbers = #tpu.dot_dimension_numbers<[1], [0], [0], [1], [0, 0, 1, 1], [], []>} : vector<1x64xf32>, vector<64x32xf32>, vector<1x32xf32> -> vector<1x32xf32>
    %107 = arith.addf %102, %106 : vector<1x32xf32>
    %108 = vector.extract_strided_slice %82 {offsets = [5, 0], sizes = [1, 64], strides = [1, 1]} : vector<6x64xf32> to vector<1x64xf32>
    %c5_66 = arith.constant 5 : index
    %c0_67 = arith.constant 0 : index
    %c0_68 = arith.constant 0 : index
    %109 = vector.load %arg4[%c5_66, %c0_67, %c0_68] : memref<6x64x32xf32, #tpu.memory_space<vmem>>, vector<1x64x32xf32>
    %110 = vector.shape_cast %109 : vector<1x64x32xf32> to vector<64x32xf32>
    %cst_69 = arith.constant dense<0.000000e+00> : vector<1x32xf32>
    %111 = tpu.matmul %108, %110, %cst_69 {dimension_numbers = #tpu.dot_dimension_numbers<[1], [0], [0], [1], [0, 0, 1, 1], [], []>} : vector<1x64xf32>, vector<64x32xf32>, vector<1x32xf32> -> vector<1x32xf32>
    %112 = arith.addf %107, %111 : vector<1x32xf32>
    %c1_70 = arith.constant 1 : index
    %c0_71 = arith.constant 0 : index
    %113 = vector.load %arg6[%c1_70, %c0_71] : memref<2x32xf32, #tpu.memory_space<vmem>>, vector<1x32xf32>
    tpu.vector_store %arg6[%c1_70, %c0_71], %112 {strides = array<i32>} : memref<2x32xf32, #tpu.memory_space<vmem>>, vector<1x32xf32>,
    return
  }
}

</mosaic_0001>

<bundles_post_ra>
// kernel: tpu_custom_call.1
= control target key start
LH: loop header
LB: loop body
LE: loop exit
PB: predicated region body
PF: predicated region fallthrough
CT: control target
= control target key end

     0   :  { %v1885_v2 = vmov 0.0|0.0   ;;  %vm1886_vm0 = vmmov 0   ;;  %v1887_v4 = vmov 0.0   ;;  %s2225_s0 = inlined_call_operand.vmem [shape: f32[2,16,64], index: 0, kind: input, shape index: {}]   ;;  %s2226_s1 = inlined_call_operand.vmem [shape: f32[6,16], index: 1, kind: input, shape index: {}]   ;;  %s2227_s2 = inlined_call_operand.vmem [shape: f32[6,1], index: 2, kind: input, shape index: {}]   ;;  %s2228_s3 = inlined_call_operand.vmem [shape: f32[6,1], index: 3, kind: input, shape index: {}]   ;;  %s2229_s4 = inlined_call_operand.vmem [shape: f32[6,64,32], index: 4, kind: input, shape index: {}]   ;;  %s2230_s5 = inlined_call_operand.vmem [shape: f32[1,32], index: 5, kind: input, shape index: {}]   ;;  %s2231_s6 = inlined_call_operand.hbm [shape: f32[2,32], index: 6, kind: output, shape index: {}]  }
   0x1   :  { %v25_v0 = vld [vmem:[%s2225_s0] sm:$0xff]  ;;  %v26_v1 = vld [vmem:[%s2225_s0 + $0x8] sm:$0xff]  ;;  %1680 = vmatprep.subr.bf16.mxu0 %v1885_v2  ;;  %1442 = vmatprep.mubr.msk.f32.mxu0 %vm1886_vm0, %v1887_v4  ;;  %v1229_v5 = vld [vmem:[%s2225_s0 + $0x10] sm:$0xff] }
   0x2   :  { %v1681_v3 = vpack.c.bf16 %v26_v1, %v25_v0  ;;  %v1230_v6 = vld [vmem:[%s2225_s0 + $0x18] sm:$0xff]  ;;  %1683 = vmatprep.subr.bf16.mxu1 %v1885_v2  ;;  %1449 = vmatprep.mubr.msk.f32.mxu1 %vm1886_vm0, %v1887_v4 }
   0x3   :  { %v1684_v7 = vpack.c.bf16 %v1230_v6, %v1229_v5 }
   0x4   :  { %11 = vsyncpa [#allocation3], 0  ;;  %1682 = vmatpush3.bf16.msra.mxu0 %v1681_v3  ;;  %v24_v8 = vld [vmem:[%s2226_s1] sm:$0x3f]  ;;  %vm27_vm1 = vcmask 130048   ;;  %vm174_vm2 = vcmask 521216  }
   0x5   :  { %1685 = vmatpush3.bf16.msra.mxu1 %v1684_v7  ;;  %1686 = vmatprep.subr.bf16.mxu0 %v1885_v2  ;;  %v1888_v25 = vmov 0   ;;  %v218_v26 = vld [vmem:[%s2229_s4] sm:$0xff]  ;;  %v219_v27 = vld [vmem:[%s2229_s4 + $0x8] sm:$0xff]  ;;  %v220_v28 = vld [vmem:[%s2229_s4 + $0x10] sm:$0xff]  ;;  %vm226_vm3 = vcmask 523264   ;;  %vm716_vm4 = vcmask 253952  }
   0x6   :  { %1758 = vmatprep.subr.bf16.mxu1 %v1885_v2  ;;  %1857 = vset.pattern.permute.xlu0 %v1888_v25  ;;  %v1687_v29 = vpack.c.bf16 %v219_v27, %v218_v26  ;;  %v221_v30 = vld [vmem:[%s2229_s4 + $0x18] sm:$0xff]  ;;  %v197_v37 = vld [vmem:[%s2227_s2] sm:$0x3f]  ;;  %v223_v40 = vld [vmem:[%s2229_s4 + $0x28] sm:$0xff] }
   0x7   :  { %1443 = vmatmul.mubr.msk.f32.vlgmr.msra.gmra.mrb[0].mxu0 %vm27_vm1, %v24_v8  ;;  %1858 = vset.pattern.permute.xlu1 %v1888_v25  ;;  %v1690_v31 = vpack.c.bf16 %v221_v30, %v220_v28  ;;  %v222_v39 = vld [vmem:[%s2229_s4 + $0x20] sm:$0xff]  ;;  %v224_v45 = vld [vmem:[%s2229_s4 + $0x30] sm:$0xff]  ;;  %v225_v46 = vld [vmem:[%s2229_s4 + $0x38] sm:$0xff] }
   0x8   :  { %1450 = vmatmul.mubr.msk.f32.vlgmr.msra.gmra.mrb[0].mxu1 %vm27_vm1, %v24_v8  ;;  %1468 = vmatprep.mubr.msk.f32.mxu0 %vm1886_vm0, %v1887_v4  ;;  %v1693_v42 = vpack.c.bf16 %v223_v40, %v222_v39  ;;  %v201_v43 = vld [vmem:[%s2228_s3] sm:$0x3f]  ;;  %v1696_v48 = vpack.c.bf16 %v225_v46, %v224_v45  ;;  %v1234_v53 = vld [vmem:[%s2229_s4 + $0x48] sm:$0xff]  ;;  %v1235_v60 = vld [vmem:[%s2229_s4 + $0x50] sm:$0xff] }
   0x9   :  { %1582 = vmatprep.mubr.msk.f32.mxu1 %vm1886_vm0, %v1887_v4  ;;  %1688 = vmatpush3.bf16.msra.mxu0 %v1687_v29  ;;  %v1233_v52 = vld [vmem:[%s2229_s4 + $0x40] sm:$0xff]  ;;  %v1236_v61 = vld [vmem:[%s2229_s4 + $0x58] sm:$0xff]  ;;  %v1238_v0 = vld [vmem:[%s2229_s4 + $0x68] sm:$0xff] }
   0xa   :  { %1760 = vmatpush3.bf16.msra.mxu1 %v1687_v29  ;;  %1689 = vmatprep.subr.bf16.mxu0 %v1885_v2  ;;  %v1699_v57 = vpack.c.bf16 %v1234_v53, %v1233_v52  ;;  %v1702_v62 = vpack.c.bf16 %v1236_v61, %v1235_v60  ;;  %v1237_v63 = vld [vmem:[%s2229_s4 + $0x60] sm:$0xff]  ;;  %v1239_v3 = vld [vmem:[%s2229_s4 + $0x70] sm:$0xff]  ;;  %v1240_v5 = vld [vmem:[%s2229_s4 + $0x78] sm:$0xff] }
   0xb   :  { %1761 = vmatprep.subr.bf16.mxu1 %v1885_v2  ;;  %v1705_v1 = vpack.c.bf16 %v1238_v0, %v1237_v63  ;;  %v1708_v6 = vpack.c.bf16 %v1240_v5, %v1239_v3  ;;  %v1242_v7 = vld [vmem:[%s2229_s4 + $0x80] sm:$0xff]  ;;  %v1243_v8 = vld [vmem:[%s2229_s4 + $0x88] sm:$0xff]  ;;  %v1253_v26 = vld [vmem:[%s2229_s4 + $0xd0] sm:$0xff] }
   0xc   :  { %v1254_v27 = vld [vmem:[%s2229_s4 + $0xd8] sm:$0xff]  ;;  %v1255_v29 = vld [vmem:[%s2229_s4 + $0xe0] sm:$0xff]  ;;  %v1256_v30 = vld [vmem:[%s2229_s4 + $0xe8] sm:$0xff] }
   0xd   :  { %1691 = vmatpush3.bf16.msra.mxu0 %v1690_v31  ;;  %v1726_v28 = vpack.c.bf16 %v1254_v27, %v1253_v26  ;;  %v1262_v40 = vld [vmem:[%s2229_s4 + $0x110] sm:$0xff]  ;;  %v1274_v60 = vld [vmem:[%s2229_s4 + $0x168] sm:$0xff]  ;;  %v1276_v63 = vld [vmem:[%s2229_s4 + $0x178] sm:$0xff] }
   0xe   :  { %1763 = vmatpush3.bf16.msra.mxu1 %v1690_v31  ;;  %1692 = vmatprep.subr.bf16.mxu0 %v1885_v2  ;;  %v1729_v31 = vpack.c.bf16 %v1256_v30, %v1255_v29  ;;  %v1266_v46 = vld [vmem:[%s2229_s4 + $0x130] sm:$0xff]  ;;  %v204_v3 = vld [vmem:[%s2230_s5] sm:$0x1] }
   0xf   :  { %1764 = vmatprep.subr.bf16.mxu1 %v1885_v2 }
  0x11   :  { %1694 = vmatpush3.bf16.msra.mxu0 %v1693_v42 }
  0x12   :  { %1766 = vmatpush3.bf16.msra.mxu1 %v1693_v42  ;;  %1695 = vmatprep.subr.bf16.mxu0 %v1885_v2 }
  0x13   :  { %1767 = vmatprep.subr.bf16.mxu1 %v1885_v2 }
  0x15   :  { %1697 = vmatpush3.bf16.msra.mxu0 %v1696_v48 }
  0x16   :  { %1769 = vmatpush3.bf16.msra.mxu1 %v1696_v48  ;;  %1698 = vmatprep.subr.bf16.mxu0 %v1885_v2 }
  0x17   :  { %1770 = vmatprep.subr.bf16.mxu1 %v1885_v2 }
  0xda   :  { %v1952_v9 = vpop.f32.mrb[0].mxu0 }
  0xdb   :  { %v1444_v10 = vpop.f32.mrb[1].mxu0  ;;  %v175_v11 = vsel %vm174_vm2, %v1952_v9, 0.0  ;;  %v1956_v12 = vpop.f32.mrb[0].mxu1 }
  0xdc   :  { %176 = vadd.xlane.f32.xlu0 %v175_v11  ;;  %v1451_v13 = vpop.f32.mrb[1].mxu1  ;;  %v179_v14 = vsel %vm174_vm2, %v1956_v12, 0.0 }
  0xdd   :  { %v1245_v13 = vld [vmem:[%s2229_s4 + $0x98] sm:$0xff] }
  0xe0   :  { %180 = vadd.xlane.f32.xlu0 %v179_v14 }
 0x169   :  { %v177_v15 = vpop.xlane.xlu0 %176 }
 0x16d   :  { %v181_v16 = vpop.xlane.xlu0 %180 }
 0x16e   :  { %v182_v17 = vadd.f32 %v181_v16, %v177_v15  ;;  %v1246_v15 = vld [vmem:[%s2229_s4 + $0xa0] sm:$0xff]  ;;  %v1247_v16 = vld [vmem:[%s2229_s4 + $0xa8] sm:$0xff] }
 0x170   :  { %v183_v18 = vmul.f32 0.0078125, %v182_v17  ;;  %v1717_v17 = vpack.c.bf16 %v1247_v16, %v1246_v15 }
 0x172   :  { %v184_v19 = vsub.f32 %v1952_v9, %v183_v18  ;;  %v190_v20 = vsub.f32 %v1956_v12, %v183_v18 }
 0x174   :  { %v185_v21 = vmul.f32 %v184_v19, %v184_v19  ;;  %v191_v23 = vmul.f32 %v190_v20, %v190_v20  ;;  %v1249_v19 = vld [vmem:[%s2229_s4 + $0xb8] sm:$0xff] }
 0x176   :  { %v186_v22 = vsel %vm174_vm2, %v185_v21, 0.0  ;;  %v192_v24 = vsel %vm174_vm2, %v191_v23, 0.0  ;;  %v1251_v21 = vld [vmem:[%s2229_s4 + $0xc0] sm:$0xff] }
 0x177   :  { %187 = vadd.xlane.f32.xlu1 %v186_v22  ;;  %v1252_v22 = vld [vmem:[%s2229_s4 + $0xc8] sm:$0xff] }
 0x178   :  { %v1723_v23 = vpack.c.bf16 %v1252_v22, %v1251_v21 }
 0x17b   :  { %193 = vadd.xlane.f32.xlu1 %v192_v24 }
 0x204   :  { %v188_v32 = vpop.xlane.xlu1 %187 }
 0x208   :  { %v194_v33 = vpop.xlane.xlu1 %193 }
 0x209   :  { %v195_v34 = vadd.f32 %v194_v33, %v188_v32  ;;  %v1257_v32 = vld [vmem:[%s2229_s4 + $0xf0] sm:$0xff]  ;;  %v1258_v33 = vld [vmem:[%s2229_s4 + $0xf8] sm:$0xff] }
 0x20b   :  { %v196_v35 = vmul.f32 0.0078125, %v195_v34  ;;  %v1732_v34 = vpack.c.bf16 %v1258_v33, %v1257_v32 }
 0x20d   :  { %v198_v36 = vadd.f32 1e-05, %v196_v35  ;;  %v1260_v35 = vld [vmem:[%s2229_s4 + $0x100] sm:$0xff] }
 0x20f   :  { %1859 = vrsqrt.f32 %v198_v36  ;;  %v1261_v36 = vld [vmem:[%s2229_s4 + $0x108] sm:$0xff] }
 0x219   :  { %v1860_v38 = vpop.eup %1859 }
 0x21a   :  { %v200_v41 = vmul.f32 %v1860_v38, %v197_v37  ;;  %v1735_v37 = vpack.c.bf16 %v1261_v36, %v1260_v35 }
 0x21c   :  { %207 = vperm.xlu0 %1857, %v200_v41   ;;  %v202_v44 = vmul.f32 %v200_v41, %v183_v18  ;;  %v1248_v18 = vld [vmem:[%s2229_s4 + $0xb0] sm:$0xff]  ;;  %v1263_v41 = vld [vmem:[%s2229_s4 + $0x118] sm:$0xff] }
 0x21d   :  { %v1720_v20 = vpack.c.bf16 %v1249_v19, %v1248_v18  ;;  %v1738_v42 = vpack.c.bf16 %v1263_v41, %v1262_v40 }
 0x21e   :  { %v203_v47 = vsub.f32 %v201_v43, %v202_v44  ;;  %v1264_v43 = vld [vmem:[%s2229_s4 + $0x120] sm:$0xff]  ;;  %v1265_v44 = vld [vmem:[%s2229_s4 + $0x128] sm:$0xff] }
 0x21f   :  { %v1741_v45 = vpack.c.bf16 %v1265_v44, %v1264_v43 }
 0x220   :  { %213 = vperm.xlu1 %1858, %v203_v47   ;;  %v1267_v47 = vld [vmem:[%s2229_s4 + $0x138] sm:$0xff] }
 0x221   :  { %v1744_v48 = vpack.c.bf16 %v1267_v47, %v1266_v46 }
 0x29b   :  { %v208_v49 = vpop.permute.xlu0 %207 }
 0x29c   :  { %v210_v50 = vmul.f32 %v208_v49, %v1952_v9  ;;  %v718_v51 = vmul.f32 %v208_v49, %v1956_v12  ;;  %v1711_v9 = vpack.c.bf16 %v1243_v8, %v1242_v7  ;;  %v1244_v12 = vld [vmem:[%s2229_s4 + $0x90] sm:$0xff]  ;;  %v1269_v49 = vld [vmem:[%s2229_s4 + $0x140] sm:$0xff] }
 0x29d   :  { %v1714_v14 = vpack.c.bf16 %v1245_v13, %v1244_v12 }
 0x29f   :  { %v214_v54 = vpop.permute.xlu1 %213 }
 0x2a0   :  { %v216_v55 = vadd.f32 %v214_v54, %v210_v50  ;;  %v719_v56 = vadd.f32 %v718_v51, %v214_v54  ;;  %v1270_v50 = vld [vmem:[%s2229_s4 + $0x148] sm:$0xff]  ;;  %v1271_v54 = vld [vmem:[%s2229_s4 + $0x150] sm:$0xff] }
 0x2a1   :  { %v1747_v51 = vpack.c.bf16 %v1270_v50, %v1269_v49 }
 0x2a2   :  { %v2010_v58 = vmax.f32 %v216_v55, 0.0  ;;  %v2012_v59 = vmax.f32 %v719_v56, 0.0  ;;  %v1272_v55 = vld [vmem:[%s2229_s4 + $0x158] sm:$0xff] }
 0x2a3   :  { %v1750_v56 = vpack.c.bf16 %v1272_v55, %v1271_v54 }
 0x2a4   :  { %1469 = vmatmul.mubr.msk.f32.vlgmr.msra.gmra.mrb[2].mxu0 %vm226_vm3, %v2010_v58  ;;  %1583 = vmatmul.mubr.msk.f32.vlgmr.msra.gmra.mrb[2].mxu1 %vm226_vm3, %v2012_v59  ;;  %v310_v10 = vrot.slane %v2010_v58, 1  ;;  %v811_v11 = vrot.slane %v2012_v59, 1  ;;  %v393_v24 = vrot.slane %v2010_v58, 2  ;;  %v893_v25 = vrot.slane %v2012_v59, 2 }
 0x2a5   :  { %1700 = vmatpush3.bf16.msra.mxu0 %v1699_v57  ;;  %1772 = vmatpush3.bf16.msra.mxu1 %v1699_v57  ;;  %v476_v38 = vrot.slane %v2010_v58, 3  ;;  %v975_v39 = vrot.slane %v2012_v59, 3  ;;  %v559_v52 = vrot.slane %v2010_v58, 4  ;;  %v1057_v53 = vrot.slane %v2012_v59, 4  ;;  %v1273_v57 = vld [vmem:[%s2229_s4 + $0x160] sm:$0xff] }
 0x2a6   :  { %1701 = vmatprep.subr.bf16.mxu0 %v1885_v2  ;;  %1773 = vmatprep.subr.bf16.mxu1 %v1885_v2  ;;  %v1753_v61 = vpack.c.bf16 %v1274_v60, %v1273_v57 }
 0x2a7   :  { %1487 = vmatprep.mubr.msk.f32.mxu0 %vm1886_vm0, %v1887_v4  ;;  %1601 = vmatprep.mubr.msk.f32.mxu1 %vm1886_vm0, %v1887_v4 }
 0x2a9   :  { %1703 = vmatpush3.bf16.msra.mxu0 %v1702_v62  ;;  %1775 = vmatpush3.bf16.msra.mxu1 %v1702_v62  ;;  %v1275_v62 = vld [vmem:[%s2229_s4 + $0x170] sm:$0xff]  ;;  %s1889_s4 = smov [#allocation2]  }
 0x2aa   :  { %1704 = vmatprep.subr.bf16.mxu0 %v1885_v2  ;;  %1776 = vmatprep.subr.bf16.mxu1 %v1885_v2  ;;  %v1756_v0 = vpack.c.bf16 %v1276_v63, %v1275_v62  ;;  %s1220_s22 = sshll.u32 %s1889_s4, 4  ;;  %s1221_s22 = int_to_ptr.vmem [resolvable:$true] %s1220_s22 }
 0x2ab   :  { %s1861_s23 = scalar_lea.vmem %s1221_s22, 32  ;;  %p1866_p1 = scmp.lt.s32.totalorder %s1221_s22, %s1221_s22 }
 0x2ac   :  { %p1862_p0 = scmp.ne.s32.totalorder %s1221_s22, %s1861_s23  ;;  %p1867_p2 = scmp.lt.s32.totalorder %s1861_s23, %s1861_s23 }
 0x2ad   :  { %1706 = vmatpush3.bf16.msra.mxu0 %v1705_v1  ;;  %1778 = vmatpush3.bf16.msra.mxu1 %v1705_v1  ;;  %v1139_v1 = vrot.slane %v2012_v59, 5 }
 0x2ae   :  { %1707 = vmatprep.subr.bf16.mxu0 %v1885_v2  ;;  %1779 = vmatprep.subr.bf16.mxu1 %v1885_v2  ;;  %p1868_p3 = por %p1867_p2, %p1866_p1 }
 0x2b0   :  { %p1869_p4 = pnand %p1868_p3, %p1862_p0 }
 0x2b1   :  { %1709 = vmatpush3.bf16.msra.mxu0 %v1708_v6  ;;  %1781 = vmatpush3.bf16.msra.mxu1 %v1708_v6 }
 0x2b2   :  { %1710 = vmatprep.subr.bf16.mxu0 %v1885_v2  ;;  %1782 = vmatprep.subr.bf16.mxu1 %v1885_v2 }
 0x2b4   :  { %1488 = vmatmul.mubr.msk.f32.vlgmr.msra.gmra.mrb[2].mxu0 %vm226_vm3, %v310_v10  ;;  %1602 = vmatmul.mubr.msk.f32.vlgmr.msra.gmra.mrb[2].mxu1 %vm226_vm3, %v811_v11 }
 0x2b5   :  { %1712 = vmatpush3.bf16.msra.mxu0 %v1711_v9  ;;  %1784 = vmatpush3.bf16.msra.mxu1 %v1711_v9 }
 0x2b6   :  { %1713 = vmatprep.subr.bf16.mxu0 %v1885_v2  ;;  %1785 = vmatprep.subr.bf16.mxu1 %v1885_v2 }
 0x2b7   :  { %1506 = vmatprep.mubr.msk.f32.mxu0 %vm1886_vm0, %v1887_v4  ;;  %1620 = vmatprep.mubr.msk.f32.mxu1 %vm1886_vm0, %v1887_v4 }
 0x2b9   :  { %1715 = vmatpush3.bf16.msra.mxu0 %v1714_v14  ;;  %1787 = vmatpush3.bf16.msra.mxu1 %v1714_v14 }
 0x2ba   :  { %1716 = vmatprep.subr.bf16.mxu0 %v1885_v2  ;;  %1788 = vmatprep.subr.bf16.mxu1 %v1885_v2 }
 0x2bd   :  { %1718 = vmatpush3.bf16.msra.mxu0 %v1717_v17  ;;  %1790 = vmatpush3.bf16.msra.mxu1 %v1717_v17 }
 0x2be   :  { %1719 = vmatprep.subr.bf16.mxu0 %v1885_v2  ;;  %1791 = vmatprep.subr.bf16.mxu1 %v1885_v2 }
 0x2c1   :  { %1721 = vmatpush3.bf16.msra.mxu0 %v1720_v20  ;;  %1793 = vmatpush3.bf16.msra.mxu1 %v1720_v20 }
 0x2c2   :  { %1722 = vmatprep.subr.bf16.mxu0 %v1885_v2  ;;  %1794 = vmatprep.subr.bf16.mxu1 %v1885_v2 }
 0x2c4   :  { %1507 = vmatmul.mubr.msk.f32.vlgmr.msra.gmra.mrb[2].mxu0 %vm226_vm3, %v393_v24  ;;  %1621 = vmatmul.mubr.msk.f32.vlgmr.msra.gmra.mrb[2].mxu1 %vm226_vm3, %v893_v25 }
 0x2c5   :  { %1724 = vmatpush3.bf16.msra.mxu0 %v1723_v23  ;;  %1796 = vmatpush3.bf16.msra.mxu1 %v1723_v23 }
 0x2c6   :  { %1725 = vmatprep.subr.bf16.mxu0 %v1885_v2  ;;  %1797 = vmatprep.subr.bf16.mxu1 %v1885_v2 }
 0x2c7   :  { %1525 = vmatprep.mubr.msk.f32.mxu0 %vm1886_vm0, %v1887_v4  ;;  %1639 = vmatprep.mubr.msk.f32.mxu1 %vm1886_vm0, %v1887_v4 }
 0x2c9   :  { %1727 = vmatpush3.bf16.msra.mxu0 %v1726_v28  ;;  %1799 = vmatpush3.bf16.msra.mxu1 %v1726_v28 }
 0x2ca   :  { %1728 = vmatprep.subr.bf16.mxu0 %v1885_v2  ;;  %1800 = vmatprep.subr.bf16.mxu1 %v1885_v2 }
 0x2cd   :  { %1730 = vmatpush3.bf16.msra.mxu0 %v1729_v31  ;;  %1802 = vmatpush3.bf16.msra.mxu1 %v1729_v31 }
 0x2ce   :  { %1731 = vmatprep.subr.bf16.mxu0 %v1885_v2  ;;  %1803 = vmatprep.subr.bf16.mxu1 %v1885_v2 }
 0x2d1   :  { %1733 = vmatpush3.bf16.msra.mxu0 %v1732_v34  ;;  %1805 = vmatpush3.bf16.msra.mxu1 %v1732_v34 }
 0x2d2   :  { %1734 = vmatprep.subr.bf16.mxu0 %v1885_v2  ;;  %1806 = vmatprep.subr.bf16.mxu1 %v1885_v2 }
 0x2d4   :  { %1526 = vmatmul.mubr.msk.f32.vlgmr.msra.gmra.mrb[2].mxu0 %vm226_vm3, %v476_v38  ;;  %1640 = vmatmul.mubr.msk.f32.vlgmr.msra.gmra.mrb[2].mxu1 %vm226_vm3, %v975_v39 }
 0x2d5   :  { %1736 = vmatpush3.bf16.msra.mxu0 %v1735_v37  ;;  %1808 = vmatpush3.bf16.msra.mxu1 %v1735_v37 }
 0x2d6   :  { %1737 = vmatprep.subr.bf16.mxu0 %v1885_v2  ;;  %1809 = vmatprep.subr.bf16.mxu1 %v1885_v2 }
 0x2d7   :  { %1544 = vmatprep.mubr.msk.f32.mxu0 %vm1886_vm0, %v1887_v4  ;;  %1658 = vmatprep.mubr.msk.f32.mxu1 %vm1886_vm0, %v1887_v4 }
 0x2d9   :  { %1739 = vmatpush3.bf16.msra.mxu0 %v1738_v42  ;;  %1811 = vmatpush3.bf16.msra.mxu1 %v1738_v42 }
 0x2da   :  { %1740 = vmatprep.subr.bf16.mxu0 %v1885_v2  ;;  %1812 = vmatprep.subr.bf16.mxu1 %v1885_v2 }
 0x2dd   :  { %1742 = vmatpush3.bf16.msra.mxu0 %v1741_v45  ;;  %1814 = vmatpush3.bf16.msra.mxu1 %v1741_v45 }
 0x2de   :  { %1743 = vmatprep.subr.bf16.mxu0 %v1885_v2  ;;  %1815 = vmatprep.subr.bf16.mxu1 %v1885_v2 }
 0x2e1   :  { %1745 = vmatpush3.bf16.msra.mxu0 %v1744_v48  ;;  %1817 = vmatpush3.bf16.msra.mxu1 %v1744_v48 }
 0x2e2   :  { %1746 = vmatprep.subr.bf16.mxu0 %v1885_v2  ;;  %1818 = vmatprep.subr.bf16.mxu1 %v1885_v2 }
 0x2e4   :  { %1545 = vmatmul.mubr.msk.f32.vlgmr.msra.gmra.mrb[2].mxu0 %vm226_vm3, %v559_v52  ;;  %1659 = vmatmul.mubr.msk.f32.vlgmr.msra.gmra.mrb[2].mxu1 %vm226_vm3, %v1057_v53 }
 0x2e5   :  { %1748 = vmatpush3.bf16.msra.mxu0 %v1747_v51  ;;  %1820 = vmatpush3.bf16.msra.mxu1 %v1747_v51 }
 0x2e6   :  { %1749 = vmatprep.subr.bf16.mxu0 %v1885_v2  ;;  %1821 = vmatprep.subr.bf16.mxu1 %v1885_v2 }
 0x2e7   :  { %1563 = vmatprep.mubr.msk.f32.mxu0 %vm1886_vm0, %v1887_v4  ;;  %1677 = vmatprep.mubr.msk.f32.mxu1 %vm1886_vm0, %v1887_v4  ;;  %v642_v4 = vrot.slane %v2010_v58, 5 }
 0x2e9   :  { %1751 = vmatpush3.bf16.msra.mxu0 %v1750_v56  ;;  %1823 = vmatpush3.bf16.msra.mxu1 %v1750_v56 }
 0x2ea   :  { %1752 = vmatprep.subr.bf16.mxu0 %v1885_v2  ;;  %1824 = vmatprep.subr.bf16.mxu1 %v1885_v2 }
 0x2ed   :  { %1754 = vmatpush3.bf16.msra.mxu0 %v1753_v61  ;;  %1826 = vmatpush3.bf16.msra.mxu1 %v1753_v61 }
 0x2ee   :  { %1755 = vmatprep.subr.bf16.mxu0 %v1885_v2  ;;  %1827 = vmatprep.subr.bf16.mxu1 %v1885_v2 }
 0x2f1   :  { %1757 = vmatpush3.bf16.msra.mxu0 %v1756_v0  ;;  %1829 = vmatpush3.bf16.msra.mxu1 %v1756_v0 }
 0x2f4   :  { %1564 = vmatmul.mubr.msk.f32.vlgmr.msra.gmra.mrb[2].mxu0 %vm226_vm3, %v642_v4  ;;  %1678 = vmatmul.mubr.msk.f32.vlgmr.msra.gmra.mrb[2].mxu1 %vm226_vm3, %v1139_v1 }
 0x3c7   :  { %v711_v5 = vpop.f32.mrb[2].mxu0  ;;  %v1208_v6 = vpop.f32.mrb[2].mxu1 }
 0x3c8   :  { %v1830_v2 = vadd.f32 %v711_v5, %v204_v3  ;;  %v1831_v7 = vadd.f32 %v1208_v6, %v204_v3  ;;  %v1565_v8 = vpop.f32.mrb[3].mxu0  ;;  %v1679_v9 = vpop.f32.mrb[3].mxu1 }
 0x3ca   :  { %717 = vst.msk [vmem:[#allocation2] sm:$0x1] %vm716_vm4, %v1830_v2  ;;  %1213 = vst.msk [vmem:[#allocation2 + $0x1] sm:$0x1] %vm716_vm4, %v1831_v7 }
 0x3cb   :  { %1872 = shalt.err (!%p1869_p4)
}
 0x3cc   :  { %s1873_s24 = scalar_lea.hbm %s2231_s6, 32 }
 0x3cd   :  { %p1874_p5 = scmp.ne.s32.totalorder %s2231_s6, %s1873_s24  ;;  %p1877_p6 = scmp.lt.u32.totalorder %s1873_s24, %s2231_s6 }
 0x3cf   :  { %p1879_p7 = pnand %p1877_p6, %p1874_p5 }
 0x3d1   :  { %1882 = shalt.err (!%p1879_p7)
}
 0x3d2   :  { %1223 = dma.vmem_to_hbm [thread:$0]  %s1221_s22, 32, %s2231_s6, [#allocation3]  }
 0x3d3   :  { %1883 = dma.done.wait [#allocation3], 32  }
 0x3d4   :  { %1884 = vsyncadd [#allocation3], 4294967264 }
 0x3d5   :  { %1227 = vsyncpa [#allocation3], 1 }

</bundles_post_ra>
